<compile_context>
chip_gen: v7x
topology: tpu7x:2x2x1
jax: 0.10.0
libtpu: 0.0.40
codegen_flags: <defaults>
</compile_context>

<pallas_src>
import jax
import jax.numpy as jnp
from jax.experimental import pallas as pl
from jax.experimental.pallas import tpu as pltpu


IN, HID, OUT = 10, 5, 7
# Packed parameter buffer layout, shape (17, 7) f32:
#   rows  0..9 , cols 0..4 : w1  (10, 5)   (transpose of torch lin1.weight)
#   row   10   , cols 0..4 : b1  (5,)
#   rows 11..15, cols 0..6 : w2  (5, 7)    (transpose of torch lin2.weight)
#   row   16   , cols 0..6 : b2  (7,)
_B1_ROW = IN                    # 10
_W2_ROW0 = IN + 1               # 11
_B2_ROW = IN + 1 + HID          # 16
_PACK_ROWS = _B2_ROW + 1        # 17
_PACK_COLS = OUT                # 7


def dummy_model_kernel(targets_ref, x_ref, params_ref, loss_ref):
    batch = x_ref.shape[0]

    x = x_ref[...]                                           # (B, 10) f32
    w1 = params_ref[0:IN, 0:HID]                             # (10, 5)
    b1 = params_ref[_B1_ROW:_B1_ROW + 1, 0:HID]              # (1, 5)
    w2 = params_ref[_W2_ROW0:_W2_ROW0 + HID, 0:OUT]          # (5, 7)
    b2 = params_ref[_B2_ROW:_B2_ROW + 1, 0:OUT]              # (1, 7)

    # ---- lin1 + ReLU, lin2: tiny padded MXU dots (f32 accumulation) -------
    h = jnp.dot(x, w1, preferred_element_type=jnp.float32) + b1
    h = jnp.maximum(h, 0.0)                                  # (B, 5)
    logits = jnp.dot(h, w2, preferred_element_type=jnp.float32) + b2  # (B, 7)

    # ---- CrossEntropyLoss (mean): logsumexp(logits) - logits[target] ------
    m = jnp.max(logits, axis=-1, keepdims=True)              # (B, 1)
    lse = m + jnp.log(jnp.sum(jnp.exp(logits - m), axis=-1, keepdims=True))

    # Rebuild the target selection from SMEM scalars (no one-hot input).
    row_ids = jax.lax.broadcasted_iota(jnp.int32, (batch, OUT), 0)
    lane_ids = jax.lax.broadcasted_iota(jnp.int32, (batch, OUT), 1)
    tgt = jnp.zeros((batch, OUT), jnp.int32)
    for i in range(batch):                                   # unrolled, B scalar reads
        tgt = jnp.where(row_ids == i, targets_ref[i], tgt)
    picked = jnp.sum(jnp.where(lane_ids == tgt, logits, 0.0))

    # Scalar loss -> SMEM (scalar store, no masked vector store).
    loss_ref[0, 0] = (jnp.sum(lse) - picked) / batch


def pack_params(w1, b1, w2, b2):
    """Pack w1 (10,5), b1 (5,), w2 (5,7), b2 (7,) into one (17,7) f32 buffer.

    Call ONCE per parameter set (hoisted out of the per-step forward path).
    """
    p = jnp.zeros((_PACK_ROWS, _PACK_COLS), jnp.float32)
    p = p.at[0:IN, 0:HID].set(w1.astype(jnp.float32))
    p = p.at[_B1_ROW, 0:HID].set(b1.astype(jnp.float32))
    p = p.at[_W2_ROW0:_W2_ROW0 + HID, 0:OUT].set(w2.astype(jnp.float32))
    p = p.at[_B2_ROW, 0:OUT].set(b2.astype(jnp.float32))
    return p


@jax.jit
def dummy_model_forward(x, packed_params, targets):
    """x: (B, 10) f32; packed_params: (17, 7) f32; targets: (B,) int32."""
    B = x.shape[0]
    cost = pl.CostEstimate(
        flops=2 * B * (IN * HID + HID * OUT),
        transcendentals=B * (OUT + 1),
        bytes_accessed=x.size * 4 + packed_params.size * 4 + targets.size * 4 + 4,
    )
    loss = pl.pallas_call(
        dummy_model_kernel,
        out_shape=jax.ShapeDtypeStruct((1, 1), jnp.float32),
        in_specs=[
            pl.BlockSpec(memory_space=pltpu.SMEM),    # targets -> SMEM scalars
            pl.BlockSpec(memory_space=pltpu.VMEM),    # x
            pl.BlockSpec(memory_space=pltpu.VMEM),    # packed params
        ],
        out_specs=pl.BlockSpec(memory_space=pltpu.SMEM),
        cost_estimate=cost,
    )(targets, x, packed_params)
    return loss[0, 0]


def _reference_forward(x, w1, b1, w2, b2, targets):
    h = jnp.maximum(x @ w1 + b1, 0.0)
    logits = h @ w2 + b2
    logp = jax.nn.log_softmax(logits, axis=-1)
    nll = -jnp.take_along_axis(logp, targets[:, None].astype(jnp.int32), axis=-1)
    return jnp.mean(nll)


if __name__ == "__main__":
    key = jax.random.PRNGKey(0)
    kx, kt, k1, k2, k3, k4 = jax.random.split(key, 6)

    B = 8

    # Deterministic synthetic parameters (PyTorch lin.weight is (out, in);
    # we store the transpose (in, out)).
    w1 = jax.random.normal(k1, (IN, HID), dtype=jnp.float32) * 0.3
    b1 = jax.random.normal(k2, (HID,), dtype=jnp.float32) * 0.1
    w2 = jax.random.normal(k3, (HID, OUT), dtype=jnp.float32) * 0.3
    b2 = jax.random.normal(k4, (OUT,), dtype=jnp.float32) * 0.1

    x = jax.random.normal(kx, (B, IN), dtype=jnp.float32)
    targets = jax.random.randint(kt, (B,), 0, OUT, dtype=jnp.int32)

    # Pack once (outside the latency-critical per-call path).
    packed = pack_params(w1, b1, w2, b2)

    loss = dummy_model_forward(x, packed, targets)
    loss = jax.block_until_ready(loss)

    ref = _reference_forward(x, w1, b1, w2, b2, targets)
    assert jnp.allclose(loss, ref, atol=1e-5, rtol=1e-5), (loss, ref)

    print("KERNEL_OK")
</pallas_src>

<mosaic_0001>
module attributes {stable_mosaic.version = 11 : i64} {
  func.func @dummy_model_kernel(%arg0: memref<8xi32, #tpu.memory_space<smem>>, %arg1: memref<8x10xf32, #tpu.memory_space<vmem>>, %arg2: memref<17x7xf32, #tpu.memory_space<vmem>>, %arg3: memref<1x1xf32, #tpu.memory_space<smem>>) attributes {dimension_semantics = [], scalar_prefetch = 0 : i64, scratch_operands = 0 : i64, tpu.core_type = #tpu.core_type<tc>} {
    %c0 = arith.constant 0 : index
    %c0_0 = arith.constant 0 : index
    %0 = vector.load %arg1[%c0, %c0_0] : memref<8x10xf32, #tpu.memory_space<vmem>>, vector<8x10xf32>
    %c0_1 = arith.constant 0 : index
    %c0_2 = arith.constant 0 : index
    %1 = vector.load %arg2[%c0_1, %c0_2] : memref<17x7xf32, #tpu.memory_space<vmem>>, vector<10x5xf32>
    %c10 = arith.constant 10 : index
    %c0_3 = arith.constant 0 : index
    %2 = vector.load %arg2[%c10, %c0_3] : memref<17x7xf32, #tpu.memory_space<vmem>>, vector<1x5xf32>
    %c11 = arith.constant 11 : index
    %c0_4 = arith.constant 0 : index
    %3 = vector.load %arg2[%c11, %c0_4] : memref<17x7xf32, #tpu.memory_space<vmem>>, vector<5x7xf32>
    %c16 = arith.constant 16 : index
    %c0_5 = arith.constant 0 : index
    %4 = vector.load %arg2[%c16, %c0_5] : memref<17x7xf32, #tpu.memory_space<vmem>>, vector<1x7xf32>
    %cst = arith.constant dense<0.000000e+00> : vector<8x5xf32>
    %5 = tpu.matmul %0, %1, %cst {dimension_numbers = #tpu.dot_dimension_numbers<[1], [0], [0], [1], [0, 0, 1, 1], [], []>} : vector<8x10xf32>, vector<10x5xf32>, vector<8x5xf32> -> vector<8x5xf32>
    %6 = vector.broadcast %2 : vector<1x5xf32> to vector<8x5xf32>
    %7 = arith.addf %5, %6 : vector<8x5xf32>
    %cst_6 = arith.constant 0.000000e+00 : f32
    %8 = vector.broadcast %cst_6 : f32 to vector<8x5xf32>
    %9 = arith.maximumf %7, %8 : vector<8x5xf32>
    %cst_7 = arith.constant dense<0.000000e+00> : vector<8x7xf32>
    %10 = tpu.matmul %9, %3, %cst_7 {dimension_numbers = #tpu.dot_dimension_numbers<[1], [0], [0], [1], [0, 0, 1, 1], [], []>} : vector<8x5xf32>, vector<5x7xf32>, vector<8x7xf32> -> vector<8x7xf32>
    %11 = vector.broadcast %4 : vector<1x7xf32> to vector<8x7xf32>
    %12 = arith.addf %10, %11 : vector<8x7xf32>
    %cst_8 = arith.constant dense<0xFF800000> : vector<8xf32>
    %13 = vector.multi_reduction <maximumf>, %12, %cst_8 [1] : vector<8x7xf32> to vector<8xf32>
    %14 = vector.shape_cast %13 : vector<8xf32> to vector<8x1xf32>
    %15 = vector.broadcast %14 : vector<8x1xf32> to vector<8x7xf32>
    %16 = arith.subf %12, %15 : vector<8x7xf32>
    %17 = math.exp %16 : vector<8x7xf32>
    %cst_9 = arith.constant dense<0.000000e+00> : vector<8xf32>
    %18 = vector.multi_reduction <add>, %17, %cst_9 [1] : vector<8x7xf32> to vector<8xf32>
    %19 = vector.shape_cast %18 : vector<8xf32> to vector<8x1xf32>
    %20 = math.log %19 : vector<8x1xf32>
    %21 = arith.addf %14, %20 : vector<8x1xf32>
    %22 = tpu.iota {dimensions = array<i32: 0>} : vector<8x7xi32>
    %23 = tpu.iota {dimensions = array<i32: 1>} : vector<8x7xi32>
    %c0_i32 = arith.constant 0 : i32
    %24 = vector.broadcast %c0_i32 : i32 to vector<8x7xi32>
    %c0_i32_10 = arith.constant 0 : i32
    %25 = vector.broadcast %c0_i32_10 : i32 to vector<8x7xi32>
    %26 = arith.cmpi eq, %22, %25 : vector<8x7xi32>
    %c0_11 = arith.constant 0 : index
    %27 = memref.load %arg0[%c0_11] : memref<8xi32, #tpu.memory_space<smem>>
    %28 = vector.broadcast %27 : i32 to vector<8x7xi32>
    %29 = arith.select %26, %28, %24 : vector<8x7xi1>, vector<8x7xi32>
    %c1_i32 = arith.constant 1 : i32
    %30 = vector.broadcast %c1_i32 : i32 to vector<8x7xi32>
    %31 = arith.cmpi eq, %22, %30 : vector<8x7xi32>
    %c1 = arith.constant 1 : index
    %32 = memref.load %arg0[%c1] : memref<8xi32, #tpu.memory_space<smem>>
    %33 = vector.broadcast %32 : i32 to vector<8x7xi32>
    %34 = arith.select %31, %33, %29 : vector<8x7xi1>, vector<8x7xi32>
    %c2_i32 = arith.constant 2 : i32
    %35 = vector.broadcast %c2_i32 : i32 to vector<8x7xi32>
    %36 = arith.cmpi eq, %22, %35 : vector<8x7xi32>
    %c2 = arith.constant 2 : index
    %37 = memref.load %arg0[%c2] : memref<8xi32, #tpu.memory_space<smem>>
    %38 = vector.broadcast %37 : i32 to vector<8x7xi32>
    %39 = arith.select %36, %38, %34 : vector<8x7xi1>, vector<8x7xi32>
    %c3_i32 = arith.constant 3 : i32
    %40 = vector.broadcast %c3_i32 : i32 to vector<8x7xi32>
    %41 = arith.cmpi eq, %22, %40 : vector<8x7xi32>
    %c3 = arith.constant 3 : index
    %42 = memref.load %arg0[%c3] : memref<8xi32, #tpu.memory_space<smem>>
    %43 = vector.broadcast %42 : i32 to vector<8x7xi32>
    %44 = arith.select %41, %43, %39 : vector<8x7xi1>, vector<8x7xi32>
    %c4_i32 = arith.constant 4 : i32
    %45 = vector.broadcast %c4_i32 : i32 to vector<8x7xi32>
    %46 = arith.cmpi eq, %22, %45 : vector<8x7xi32>
    %c4 = arith.constant 4 : index
    %47 = memref.load %arg0[%c4] : memref<8xi32, #tpu.memory_space<smem>>
    %48 = vector.broadcast %47 : i32 to vector<8x7xi32>
    %49 = arith.select %46, %48, %44 : vector<8x7xi1>, vector<8x7xi32>
    %c5_i32 = arith.constant 5 : i32
    %50 = vector.broadcast %c5_i32 : i32 to vector<8x7xi32>
    %51 = arith.cmpi eq, %22, %50 : vector<8x7xi32>
    %c5 = arith.constant 5 : index
    %52 = memref.load %arg0[%c5] : memref<8xi32, #tpu.memory_space<smem>>
    %53 = vector.broadcast %52 : i32 to vector<8x7xi32>
    %54 = arith.select %51, %53, %49 : vector<8x7xi1>, vector<8x7xi32>
    %c6_i32 = arith.constant 6 : i32
    %55 = vector.broadcast %c6_i32 : i32 to vector<8x7xi32>
    %56 = arith.cmpi eq, %22, %55 : vector<8x7xi32>
    %c6 = arith.constant 6 : index
    %57 = memref.load %arg0[%c6] : memref<8xi32, #tpu.memory_space<smem>>
    %58 = vector.broadcast %57 : i32 to vector<8x7xi32>
    %59 = arith.select %56, %58, %54 : vector<8x7xi1>, vector<8x7xi32>
    %c7_i32 = arith.constant 7 : i32
    %60 = vector.broadcast %c7_i32 : i32 to vector<8x7xi32>
    %61 = arith.cmpi eq, %22, %60 : vector<8x7xi32>
    %c7 = arith.constant 7 : index
    %62 = memref.load %arg0[%c7] : memref<8xi32, #tpu.memory_space<smem>>
    %63 = vector.broadcast %62 : i32 to vector<8x7xi32>
    %64 = arith.select %61, %63, %59 : vector<8x7xi1>, vector<8x7xi32>
    %65 = arith.cmpi eq, %23, %64 : vector<8x7xi32>
    %cst_12 = arith.constant 0.000000e+00 : f32
    %66 = vector.broadcast %cst_12 : f32 to vector<8x7xf32>
    %67 = arith.select %65, %12, %66 : vector<8x7xi1>, vector<8x7xf32>
    %68 = vector.shape_cast %67 : vector<8x7xf32> to vector<1x8x7xf32>
    %cst_13 = arith.constant dense<0.000000e+00> : vector<1xf32>
    %69 = vector.multi_reduction <add>, %68, %cst_13 [1, 2] : vector<1x8x7xf32> to vector<1xf32>
    %70 = vector.shape_cast %69 : vector<1xf32> to vector<1x1x1xf32>
    %71 = vector.extract %70[0, 0, 0] : f32 from vector<1x1x1xf32>
    %72 = vector.shape_cast %21 : vector<8x1xf32> to vector<1x8x1xf32>
    %cst_14 = arith.constant dense<0.000000e+00> : vector<1xf32>
    %73 = vector.multi_reduction <add>, %72, %cst_14 [1, 2] : vector<1x8x1xf32> to vector<1xf32>
    %74 = vector.shape_cast %73 : vector<1xf32> to vector<1x1x1xf32>
    %75 = vector.extract %74[0, 0, 0] : f32 from vector<1x1x1xf32>
    %76 = arith.subf %75, %71 : f32
    %cst_15 = arith.constant 8.000000e+00 : f32
    %77 = arith.divf %76, %cst_15 : f32
    %c0_16 = arith.constant 0 : index
    %c0_17 = arith.constant 0 : index
    %78 = memref.load %arg3[%c0_16, %c0_17] : memref<1x1xf32, #tpu.memory_space<smem>>
    memref.store %77, %arg3[%c0_16, %c0_17] : memref<1x1xf32, #tpu.memory_space<smem>>
    return
  }
}

</mosaic_0001>

<bundles_post_ra>
// kernel: dummy_model_forward.1
= control target key start
LH: loop header
LB: loop body
LE: loop exit
PB: predicated region body
PF: predicated region fallthrough
CT: control target
= control target key end

     0   :  { %8 = vsyncpa [#allocation4], 0  ;;  %s427_s0 = inlined_call_operand.vmem [shape: s32[8], index: 0, kind: input, shape index: {}]   ;;  %s428_s1 = inlined_call_operand.vmem [shape: f32[8,10], index: 1, kind: input, shape index: {}]   ;;  %s429_s2 = inlined_call_operand.vmem [shape: f32[17,7], index: 2, kind: input, shape index: {}]   ;;  %s430_s3 = inlined_call_operand.hbm [shape: f32[1,1], index: 3, kind: output, shape index: {}]  }
   0x1   :  { %9 = vsyncpa [#allocation3], 0  ;;  %s16_s14 = sshll.u32 %s427_s0, 4  ;;  %s17_s14 = int_to_ptr.vmem [resolvable:$true] %s16_s14 }
   0x2   :  { %s339_s15 = scalar_lea.vmem %s17_s14, 16  ;;  %p344_p1 = scmp.lt.s32.totalorder %s17_s14, %s17_s14 }
   0x3   :  { %p340_p0 = scmp.ne.s32.totalorder %s17_s14, %s339_s15  ;;  %p345_p2 = scmp.lt.s32.totalorder %s339_s15, %s339_s15 }
   0x5   :  { %p346_p3 = por %p345_p2, %p344_p1 }
   0x7   :  { %p347_p4 = pnand %p346_p3, %p340_p0 }
   0x9   :  { %350 = shalt.err (!%p347_p4)
}
   0xa   :  { %s365_s16 = smov [#allocation2]  }
   0xb   :  { %19 = dma.vmem_to_smem %s17_s14, 16, %s365_s16, [#allocation4]  }
   0xc   :  { %361 = dma.done.wait [#allocation4], 16  }
   0xd   :  { %362 = vsyncadd [#allocation4], 4294967280 }
   0xe   :  { %27 = sfence }
   0xf   :  { %v29_v0 = vld [vmem:[%s429_s2] sm:$0xff]  ;;  %v30_v1 = vld [vmem:[%s429_s2 + $0x8] sm:$0x3]  ;;  %vm42_vm0 = vcmask 1041408   ;;  %v366_v2 = vmov 0.0|0.0   ;;  %vm367_vm1 = vmmov 1   ;;  %v212_v12 = vlaneseq }
  0x10   :  { %321 = vmatprep.subr.bf16.mxu0 %v366_v2  ;;  %v322_v3 = vpack.c.bf16 %v30_v1, %v29_v0  ;;  %vm323_vm2 = vmpackc.low %vm42_vm0, %vm367_vm1  ;;  %vm368_vm3 = vmmov 0   ;;  %v369_v4 = vmov 0.0   ;;  %v28_v5 = vld [vmem:[%s428_s1] sm:$0xff]  ;;  %vm38_vm4 = vcmask 80896   ;;  %v32_v6 = vld [vmem:[%s429_s2 + $0xb] sm:$0x1f] }
  0x11   :  { %313 = vmatprep.mubr.msk.f32.mxu0 %vm368_vm3, %v369_v4  ;;  %316 = vmatprep.subr.mxu1 %v369_v4  ;;  %vm125_vm5 = vcmask 1044480   ;;  %v291_v7 = vld [vmem:[%s429_s2 + $0xa] ss:$0 sm:$0xff]  ;;  %vm121_vm6 = vcmask 39936   ;;  %s217_s1 = sld [smem:[#allocation2]]  ;;  %s297_s26 = sld [smem:[#allocation2 + $0x1]] }
  0x12   :  { %324 = vmatpush3.bf16.msk.msra.mxu0 %vm323_vm2, %v322_v3  ;;  %318 = vmatprep.mubr.msk.f32.mxu1 %vm368_vm3, %v369_v4  ;;  %v213_v13 = vshrl.u32 %v212_v12, 7  ;;  %s298_s27 = sld [smem:[#allocation2 + $0x2]]  ;;  %s299_s28 = sld [smem:[#allocation2 + $0x3]]  ;;  %v215_v29 = vand.u32 127, %v212_v12  ;;  %v294_v31 = vld [vmem:[%s429_s2 + $0x10] ss:$0 sm:$0xff] }
  0x13   :  { %317 = vmatpush3.msk.msra.mxu1 %vm125_vm5, %v32_v6  ;;  %s300_s29 = sld [smem:[#allocation2 + $0x4]]  ;;  %s301_s30 = sld [smem:[#allocation2 + $0x5]]  ;;  %vm199_vm15 = vcmask 56320   ;;  %vm260_vm1 = vcmask 7168  }
  0x14   :  { %vm216_vm7 = vcmp.eq.s32.totalorder %v213_v13, 0  ;;  %vm220_vm8 = vcmp.eq.s32.totalorder %v213_v13, 1  ;;  %vm224_vm9 = vcmp.eq.s32.totalorder %v213_v13, 2  ;;  %vm228_vm10 = vcmp.eq.s32.totalorder %v213_v13, 3  ;;  %s302_s4 = sld [smem:[#allocation2 + $0x6]]  ;;  %s303_s5 = sld [smem:[#allocation2 + $0x7]] }
  0x15   :  { %314 = vmatmul.mubr.msk.f32.vlgmr.msra.gmra.mrb[0].mxu0 %vm38_vm4, %v28_v5  ;;  %vm232_vm11 = vcmp.eq.s32.totalorder %v213_v13, 4  ;;  %vm236_vm12 = vcmp.eq.s32.totalorder %v213_v13, 5  ;;  %vm240_vm13 = vcmp.eq.s32.totalorder %v213_v13, 6  ;;  %vm244_vm14 = vcmp.eq.s32.totalorder %v213_v13, 7  ;;  %s351_s13 = scalar_lea.hbm %s430_s3, 16 }
  0x16   :  { %p352_p5 = scmp.ne.s32.totalorder %s430_s3, %s351_s13  ;;  %p355_p6 = scmp.lt.u32.totalorder %s351_s13, %s430_s3 }
  0x17   :  { %v218_v14 = vstv %s217_s1  ;;  %v222_v16 = vstv %s297_s26 }
  0x18   :  { %v219_v15 = vsel %vm216_vm7, %v218_v14, 0  ;;  %v226_v18 = vstv %s298_s27  ;;  %v230_v20 = vstv %s299_s28  ;;  %p357_p7 = pnand %p355_p6, %p352_p5 }
  0x19   :  { %v223_v17 = vsel %vm220_vm8, %v222_v16, %v219_v15  ;;  %v234_v22 = vstv %s300_s29  ;;  %v238_v24 = vstv %s301_s30 }
  0x1a   :  { %v227_v19 = vsel %vm224_vm9, %v226_v18, %v223_v17  ;;  %v242_v26 = vstv %s302_s4  ;;  %v246_v28 = vstv %s303_s5 }
  0x1b   :  { %v231_v21 = vsel %vm228_vm10, %v230_v20, %v227_v19 }
  0x1c   :  { %v235_v23 = vsel %vm232_vm11, %v234_v22, %v231_v21 }
  0x1d   :  { %v239_v25 = vsel %vm236_vm12, %v238_v24, %v235_v23 }
  0x1e   :  { %v243_v27 = vsel %vm240_vm13, %v242_v26, %v239_v25 }
  0x1f   :  { %v247_v30 = vsel %vm244_vm14, %v246_v28, %v243_v27 }
  0x20   :  { %vm248_vm0 = vcmp.eq.s32.totalorder %v215_v29, %v247_v30 }
  0xe8   :  { %v112_v8 = vpop.f32.mrb[0].mxu0 }
  0xe9   :  { %v113_v9 = vadd.f32 %v291_v7, %v112_v8  ;;  %v315_v10 = vpop.f32.mrb[1].mxu0 }
  0xeb   :  { %v116_v11 = vmax.f32 %v113_v9, 0.0 }
  0xed   :  { %319 = vmatmul.mubr.msk.f32.vlgmr.msra.gmra.mrb[0].mxu1 %vm121_vm6, %v116_v11 }
 0x1c0   :  { %v195_v32 = vpop.f32.mrb[0].mxu1 }
 0x1c1   :  { %v196_v33 = vadd.f32 %v294_v31, %v195_v32  ;;  %v320_v34 = vpop.f32.mrb[1].mxu1 }
 0x1c3   :  { %v200_v35 = vsel %vm199_vm15, %v196_v33, -inf  ;;  %v249_v36 = vsel %vm248_vm0, %v196_v33, 0.0 }
 0x1c4   :  { %201 = vmax.xlane.f32.xlu0 %v200_v35  ;;  %v250_v37 = vsel %vm199_vm15, %v249_v36, 0.0 }
 0x1c5   :  { %251 = vadd.xlane.f32.xlu1 %v250_v37 }
 0x251   :  { %v202_v38 = vpop.xlane.xlu0 %201 }
 0x252   :  { %v203_v39 = vsub.f32 %v196_v33, %v202_v38  ;;  %v252_v40 = vpop.xlane.xlu1 %251 }
 0x253   :  { %v253_v41 = vrot.slane %v252_v40, 4 }
 0x254   :  { %v204_v42 = vmul.f32 1.442695, %v203_v39 }
 0x255   :  { %v254_v43 = vadd.f32 %v253_v41, %v252_v40 }
 0x256   :  { %335 = vpow2.f32 %v204_v42 }
 0x257   :  { %v255_v44 = vrot.slane %v254_v43, 2 }
 0x259   :  { %v256_v45 = vadd.f32 %v255_v44, %v254_v43 }
 0x25b   :  { %v257_v46 = vrot.slane %v256_v45, 1 }
 0x25d   :  { %v258_v47 = vadd.f32 %v257_v46, %v256_v45 }
 0x25f   :  { %325 = vpush %v258_v47 }
 0x260   :  { %v336_v48 = vpop.eup %335 }
 0x261   :  { %v206_v49 = vsel %vm199_vm15, %v336_v48, 0.0 }
 0x262   :  { %207 = vadd.xlane.f32.xlu0 %v206_v49 }
 0x290   :  { %s326_s2 = spop %325 }
 0x2ef   :  { %v208_v50 = vpop.xlane.xlu0 %207 }
 0x2f0   :  { %337 = vlog2.f32 %v208_v50 }
 0x2fa   :  { %v338_v51 = vpop.eup %337 }
 0x2fb   :  { %v210_v52 = vmul.f32 0.6931472, %v338_v51 }
 0x2fd   :  { %v211_v53 = vadd.f32 %v210_v52, %v202_v38 }
 0x2ff   :  { %v261_v54 = vsel %vm260_vm1, %v211_v53, 0.0 }
 0x300   :  { %262 = vadd.xlane.f32.xlu1 %v261_v54 }
 0x38d   :  { %v263_v55 = vpop.xlane.xlu1 %262 }
 0x38e   :  { %v264_v56 = vrot.slane %v263_v55, 4 }
 0x390   :  { %v265_v57 = vadd.f32 %v264_v56, %v263_v55 }
 0x392   :  { %v266_v58 = vrot.slane %v265_v57, 2 }
 0x394   :  { %v267_v59 = vadd.f32 %v266_v58, %v265_v57 }
 0x396   :  { %v268_v60 = vrot.slane %v267_v59, 1 }
 0x398   :  { %v269_v61 = vadd.f32 %v268_v60, %v267_v59 }
 0x39a   :  { %327 = vpush %v269_v61 }
 0x3cb   :  { %s328_s8 = spop %327 }
 0x3cc   :  { %s271_s9 = ssub.f32 %s328_s8, %s326_s2 }
 0x3ce   :  { %s274_s10 = smul.f32 0.125, %s271_s9 }
 0x3d0   :  { %276 = sst [smem:[#allocation5]] %s274_s10 }
 0x3d1   :  { %360 = shalt.err (!%p357_p7)
}
 0x3d2   :  { %s370_s18 = smov [#allocation5]  }
 0x3d3   :  { %284 = dma.smem_to_hbm %s370_s18, 16, %s430_s3, [#allocation3]  }
 0x3d4   :  { %363 = dma.done.wait [#allocation3], 16  }
 0x3d5   :  { %364 = vsyncadd [#allocation3], 4294967280 }
 0x3d6   :  { %288 = sfence }
 0x3d7   :  { %289 = vsyncpa [#allocation3], 1 }
 0x3d8   :  { %290 = vsyncpa [#allocation4], 1 }

</bundles_post_ra>
